<compile_context>
chip_gen: v5e
topology: v5e:2x2
jax: 0.10.0
libtpu: 0.0.40
codegen_flags: <defaults>
</compile_context>

<pallas_src>
import functools

import jax
import jax.numpy as jnp
from jax.experimental import pallas as pl
from jax.experimental.pallas import tpu as pltpu


def _round_up(x, m):
    return ((x + m - 1) // m) * m


def _lovasz_kernel(tri_ref, err_ref, gt_ref, meta_ref, out_ref):
    # tri_ref  : (SEG, SEG) bf16, tri[j, i] = 1 iff j <= i (resident, DMA'd once)
    # err_ref  : (RB, SEG) f32 hinge errors, globally sorted descending per image
    # gt_ref   : (RB, SEG) bf16 labels (exactly 0/1), same permutation as err
    # meta_ref : (RB, 3)  f32 per-row [gts, cross-segment prefix, pos0]
    # out_ref  : (RB, 1)  f32 per-row partial loss
    gt = gt_ref[...]                              # (RB, SEG) bf16
    err = err_ref[...]                            # (RB, SEG) f32
    meta = meta_ref[...]                          # (RB, 3)  f32
    gts = meta[:, 0:1]                            # per-image positive count
    prefix = meta[:, 1:2]                         # cumsum(gt) before this segment
    pos0 = meta[:, 2:3]                           # global 0-based offset of lane 0

    # Segment-local inclusive cumsum of the 0/1 labels on the MXU (bf16 is
    # exact for 0/1 data, accumulation in f32), plus the wrapper-computed
    # cross-segment prefix -> global inclusive cumsum of gt.
    cs = jnp.dot(gt, tri_ref[...], preferred_element_type=jnp.float32) + prefix

    col = jax.lax.broadcasted_iota(jnp.int32, err.shape, 1).astype(jnp.float32)
    pos = pos0 + col + 1.0                        # global 1-based position
    # NOTE: positions / cumsums carried in f32 -> exact only for P < 2^24.

    # Lovasz gradient, analytically:
    #   inter[i] = gts - cs[i],   union[i] = gts + i - cs[i]   (cumsum(1-gt) == i - cs)
    #   jac[i]   = 1 - inter[i]/union[i]
    #   grad[i]  = jac[i] - jac[i-1],  grad[1] = jac[1]
    inter = gts - cs
    union = gts + pos - cs                        # >= pos >= 1
    gtf = gt.astype(jnp.float32)
    cs_p = cs - gtf                               # cumsum at position i-1
    union_p = jnp.maximum(gts + (pos - 1.0) - cs_p, 1.0)   # clamp: avoids inf at pos==1, gts==0
    # At pos == 1, force jac[i-1] := 0 by setting inter_p := union_p.
    inter_p = jnp.where(pos == 1.0, union_p, gts - cs_p)

    # grad = inter_p/union_p - inter/union, collapsed into a single reciprocal.
    # (Kept exact rather than approx=True to preserve headroom vs the 1e-3
    #  reference tolerance; it is not the bottleneck.)
    grad = (inter_p * union - inter * union_p) * pl.reciprocal(union * union_p)

    w = jnp.maximum(err, 0.0) * grad
    out_ref[...] = jnp.sum(w, axis=-1, keepdims=True)


def lovasz_hinge_loss(logits, labels, *, seg=256, rows_per_block=512):
    """Pallas TPU LovaszHingeLoss(per_image=True, ignore_index=None).

    logits: (B, H, W) float logits (pre-sigmoid)
    labels: (B, H, W) binary masks (0/1)
    returns scalar f32 loss (mean of per-image Lovasz hinge losses).
    """
    B, H, W = logits.shape
    P = H * W

    SEG = seg                                   # lane width of one segment row
    Pp = _round_up(P, SEG)
    n_seg = Pp // SEG                           # segment rows per image

    lg = logits.reshape(B, P).astype(jnp.float32)
    lb = labels.reshape(B, P).astype(jnp.float32)

    # Hinge errors; pixel padding uses err=-1e30 / gt=0 so padded elements sort
    # to the end and contribute exactly 0 (relu(-1e30) = 0) to the loss.
    signs = 2.0 * lb - 1.0
    errors = 1.0 - lg * signs
    errors = jnp.pad(errors, ((0, 0), (0, Pp - P)), constant_values=-1e30)
    lbp = jnp.pad(lb, ((0, 0), (0, Pp - P)))

    # TODO(synk): the descending sort has no Pallas/TPU primitive; it runs as a
    # single stable plain-JAX multi-operand sort (labels as payload, zero
    # gathers) and will dominate end-to-end time for large P.
    neg_sorted, gt_sorted = jax.lax.sort(
        (-errors, lbp), dimension=-1, is_stable=True, num_keys=1)
    errors_sorted = -neg_sorted

    gts = jnp.sum(lbp, axis=-1)                                  # (B,) positives per image

    # Pass 1 (plain JAX): per-segment label sums -> exclusive cross-segment
    # prefixes of cumsum(gt).  Every segment row is then independent, so the
    # kernel grid carries no state and can be fully "parallel" (v7x megacore).
    gt3 = gt_sorted.reshape(B, n_seg, SEG)
    seg_sums = jnp.sum(gt3, axis=-1)                             # (B, n_seg)
    seg_prefix = jnp.cumsum(seg_sums, axis=-1) - seg_sums        # exclusive scan

    gts_row = jnp.broadcast_to(gts[:, None], (B, n_seg))
    pos0_row = jnp.broadcast_to(
        (jnp.arange(n_seg, dtype=jnp.float32) * SEG)[None, :], (B, n_seg))
    meta = jnp.stack([gts_row, seg_prefix, pos0_row], axis=-1)   # (B, n_seg, 3)

    # Repack to segment rows in HBM (free, row-major): (B, Pp) -> (B*n_seg, SEG).
    R0 = B * n_seg
    RB = min(rows_per_block, _round_up(R0, 8))                   # MXU M per step
    R = _round_up(R0, RB)
    pad_r = R - R0

    err2 = jnp.pad(errors_sorted.reshape(R0, SEG), ((0, pad_r), (0, 0)))
    gt2 = jnp.pad(gt_sorted.reshape(R0, SEG).astype(jnp.bfloat16),  # lossless 0/1
                  ((0, pad_r), (0, 0)))
    meta2 = jnp.pad(meta.reshape(R0, 3), ((0, pad_r), (0, 0)))

    # Inclusive-cumsum operand: tri[j, i] = 1 iff j <= i  =>  x @ tri == cumsum(x).
    r_i = jax.lax.broadcasted_iota(jnp.int32, (SEG, SEG), 0)
    c_i = jax.lax.broadcasted_iota(jnp.int32, (SEG, SEG), 1)
    tri = (r_i <= c_i).astype(jnp.bfloat16)

    partial = pl.pallas_call(
        _lovasz_kernel,
        out_shape=jax.ShapeDtypeStruct((R, 1), jnp.float32),
        grid=(R // RB,),
        in_specs=[
            pl.BlockSpec((SEG, SEG), lambda r: (0, 0)),   # triangular operand, resident
            pl.BlockSpec((RB, SEG), lambda r: (r, 0)),    # sorted errors (f32)
            pl.BlockSpec((RB, SEG), lambda r: (r, 0)),    # sorted labels (bf16)
            pl.BlockSpec((RB, 3), lambda r: (r, 0)),      # [gts, prefix, pos0]
        ],
        out_specs=pl.BlockSpec((RB, 1), lambda r: (r, 0)),
        compiler_params=pltpu.CompilerParams(
            dimension_semantics=("parallel",)),
    )(tri, err2, gt2, meta2)

    per_image = jnp.sum(partial[:R0, 0].reshape(B, n_seg), axis=-1)
    return jnp.mean(per_image)


def _reference(logits, labels):
    """Pure-JAX port of the PyTorch module (per_image=True, ignore_index=None)."""
    B = logits.shape[0]
    lg = logits.reshape(B, -1).astype(jnp.float32)
    lb = labels.reshape(B, -1).astype(jnp.float32)
    signs = 2.0 * lb - 1.0
    errors = 1.0 - lg * signs
    order = jnp.argsort(-errors, axis=-1)
    err_s = jnp.take_along_axis(errors, order, axis=-1)
    gt_s = jnp.take_along_axis(lb, order, axis=-1)
    gts = jnp.sum(gt_s, axis=-1, keepdims=True)
    inter = gts - jnp.cumsum(gt_s, axis=-1)
    union = gts + jnp.cumsum(1.0 - gt_s, axis=-1)
    jac = 1.0 - inter / union
    grad = jnp.concatenate([jac[:, :1], jac[:, 1:] - jac[:, :-1]], axis=-1)
    return jnp.mean(jnp.sum(jnp.maximum(err_s, 0.0) * grad, axis=-1))


if __name__ == "__main__":
    key = jax.random.PRNGKey(0)
    k1, k2 = jax.random.split(key)
    B, H, W = 2, 16, 16
    logits = jax.random.normal(k1, (B, H, W), dtype=jnp.float32)
    labels = (jax.random.uniform(k2, (B, H, W)) > 0.5).astype(jnp.float32)

    loss = jax.jit(lovasz_hinge_loss)(logits, labels)
    jax.block_until_ready(loss)

    ref = _reference(logits, labels)
    assert jnp.allclose(loss, ref, rtol=1e-3, atol=1e-3), (float(loss), float(ref))
    print("KERNEL_OK")
</pallas_src>

<mosaic_0001>
module attributes {stable_mosaic.version = 11 : i64} {
  func.func @_lovasz_kernel(%arg0: i32, %arg1: memref<256x256xbf16, #tpu.memory_space<vmem>>, %arg2: memref<8x256xf32, #tpu.memory_space<vmem>>, %arg3: memref<8x256xbf16, #tpu.memory_space<vmem>>, %arg4: memref<8x3xf32, #tpu.memory_space<vmem>>, %arg5: memref<8x1xf32, #tpu.memory_space<vmem>>) attributes {dimension_semantics = [#tpu.dimension_semantics<parallel>], iteration_bounds = array<i64: 1>, scalar_prefetch = 0 : i64, scratch_operands = 0 : i64, tpu.core_type = #tpu.core_type<tc>, window_params = [{pipeline_mode = #tpu.pipeline_mode<synchronous>, transform_indices = @transform_0, window_bounds = array<i64: 256, 256>}, {transform_indices = @transform_1, window_bounds = array<i64: 8, 256>}, {transform_indices = @transform_2, window_bounds = array<i64: 8, 256>}, {transform_indices = @transform_3, window_bounds = array<i64: 8, 3>}, {transform_indices = @transform_4, window_bounds = array<i64: 8, 1>}]} {
    %c0 = arith.constant 0 : index
    %c0_0 = arith.constant 0 : index
    %0 = vector.load %arg3[%c0, %c0_0] : memref<8x256xbf16, #tpu.memory_space<vmem>>, vector<8x256xbf16>
    %c0_1 = arith.constant 0 : index
    %c0_2 = arith.constant 0 : index
    %1 = vector.load %arg2[%c0_1, %c0_2] : memref<8x256xf32, #tpu.memory_space<vmem>>, vector<8x256xf32>
    %c0_3 = arith.constant 0 : index
    %c0_4 = arith.constant 0 : index
    %2 = vector.load %arg4[%c0_3, %c0_4] : memref<8x3xf32, #tpu.memory_space<vmem>>, vector<8x3xf32>
    %3 = vector.extract_strided_slice %2 {offsets = [0, 0], sizes = [8, 1], strides = [1, 1]} : vector<8x3xf32> to vector<8x1xf32>
    %4 = vector.extract_strided_slice %2 {offsets = [0, 1], sizes = [8, 1], strides = [1, 1]} : vector<8x3xf32> to vector<8x1xf32>
    %5 = vector.extract_strided_slice %2 {offsets = [0, 2], sizes = [8, 1], strides = [1, 1]} : vector<8x3xf32> to vector<8x1xf32>
    %c0_5 = arith.constant 0 : index
    %c0_6 = arith.constant 0 : index
    %6 = vector.load %arg1[%c0_5, %c0_6] : memref<256x256xbf16, #tpu.memory_space<vmem>>, vector<256x256xbf16>
    %cst = arith.constant dense<0.000000e+00> : vector<8x256xf32>
    %7 = tpu.matmul %0, %6, %cst {dimension_numbers = #tpu.dot_dimension_numbers<[1], [0], [0], [1], [0, 0, 1, 1], [], []>} : vector<8x256xbf16>, vector<256x256xbf16>, vector<8x256xf32> -> vector<8x256xf32>
    %8 = vector.broadcast %4 : vector<8x1xf32> to vector<8x256xf32>
    %9 = arith.addf %7, %8 : vector<8x256xf32>
    %10 = tpu.iota {dimensions = array<i32: 1>} : vector<8x256xi32>
    %11 = arith.sitofp %10 : vector<8x256xi32> to vector<8x256xf32>
    %12 = vector.broadcast %5 : vector<8x1xf32> to vector<8x256xf32>
    %13 = arith.addf %12, %11 : vector<8x256xf32>
    %cst_7 = arith.constant 1.000000e+00 : f32
    %14 = vector.broadcast %cst_7 : f32 to vector<8x256xf32>
    %15 = arith.addf %13, %14 : vector<8x256xf32>
    %16 = vector.broadcast %3 : vector<8x1xf32> to vector<8x256xf32>
    %17 = arith.subf %16, %9 : vector<8x256xf32>
    %18 = vector.broadcast %3 : vector<8x1xf32> to vector<8x256xf32>
    %19 = arith.addf %18, %15 : vector<8x256xf32>
    %20 = arith.subf %19, %9 : vector<8x256xf32>
    %21 = arith.extf %0 : vector<8x256xbf16> to vector<8x256xf32>
    %22 = arith.subf %9, %21 : vector<8x256xf32>
    %cst_8 = arith.constant 1.000000e+00 : f32
    %23 = vector.broadcast %cst_8 : f32 to vector<8x256xf32>
    %24 = arith.subf %15, %23 : vector<8x256xf32>
    %25 = vector.broadcast %3 : vector<8x1xf32> to vector<8x256xf32>
    %26 = arith.addf %25, %24 : vector<8x256xf32>
    %27 = arith.subf %26, %22 : vector<8x256xf32>
    %cst_9 = arith.constant 1.000000e+00 : f32
    %28 = vector.broadcast %cst_9 : f32 to vector<8x256xf32>
    %29 = arith.maximumf %27, %28 : vector<8x256xf32>
    %cst_10 = arith.constant 1.000000e+00 : f32
    %30 = vector.broadcast %cst_10 : f32 to vector<8x256xf32>
    %31 = arith.cmpf oeq, %15, %30 : vector<8x256xf32>
    %32 = vector.broadcast %3 : vector<8x1xf32> to vector<8x256xf32>
    %33 = arith.subf %32, %22 : vector<8x256xf32>
    %34 = arith.select %31, %29, %33 : vector<8x256xi1>, vector<8x256xf32>
    %35 = arith.mulf %34, %20 : vector<8x256xf32>
    %36 = arith.mulf %17, %29 : vector<8x256xf32>
    %37 = arith.subf %35, %36 : vector<8x256xf32>
    %38 = arith.mulf %20, %29 : vector<8x256xf32>
    %39 = tpu.reciprocal %38 : vector<8x256xf32> -> vector<8x256xf32>
    %40 = arith.mulf %37, %39 : vector<8x256xf32>
    %cst_11 = arith.constant 0.000000e+00 : f32
    %41 = vector.broadcast %cst_11 : f32 to vector<8x256xf32>
    %42 = arith.maximumf %1, %41 : vector<8x256xf32>
    %43 = arith.mulf %42, %40 : vector<8x256xf32>
    %cst_12 = arith.constant dense<0.000000e+00> : vector<8xf32>
    %44 = vector.multi_reduction <add>, %43, %cst_12 [1] : vector<8x256xf32> to vector<8xf32>
    %45 = vector.shape_cast %44 : vector<8xf32> to vector<8x1xf32>
    %c0_13 = arith.constant 0 : index
    %c0_14 = arith.constant 0 : index
    %46 = vector.load %arg5[%c0_13, %c0_14] : memref<8x1xf32, #tpu.memory_space<vmem>>, vector<8x1xf32>
    tpu.vector_store %arg5[%c0_13, %c0_14], %45 {strides = array<i32>} : memref<8x1xf32, #tpu.memory_space<vmem>>, vector<8x1xf32>,
    return
  }
  func.func @transform_0(%arg0: i32) -> (i32, i32) {
    %c0_i32 = arith.constant 0 : i32
    %c0_i32_0 = arith.constant 0 : i32
    %c0_i32_1 = arith.constant 0 : i32
    return %c0_i32, %c0_i32_0 : i32, i32
  }
  func.func @transform_1(%arg0: i32) -> (i32, i32) {
    %c0_i32 = arith.constant 0 : i32
    %c0_i32_0 = arith.constant 0 : i32
    return %arg0, %c0_i32 : i32, i32
  }
  func.func @transform_2(%arg0: i32) -> (i32, i32) {
    %c0_i32 = arith.constant 0 : i32
    %c0_i32_0 = arith.constant 0 : i32
    return %arg0, %c0_i32 : i32, i32
  }
  func.func @transform_3(%arg0: i32) -> (i32, i32) {
    %c0_i32 = arith.constant 0 : i32
    %c0_i32_0 = arith.constant 0 : i32
    return %arg0, %c0_i32 : i32, i32
  }
  func.func @transform_4(%arg0: i32) -> (i32, i32) {
    %c0_i32 = arith.constant 0 : i32
    %c0_i32_0 = arith.constant 0 : i32
    return %arg0, %c0_i32 : i32, i32
  }
}

</mosaic_0001>

<bundles_post_ra>
// kernel: neg.3
= control target key start
LH: loop header
LB: loop body
LE: loop exit
PB: predicated region body
PF: predicated region fallthrough
CT: control target
= control target key end

     0   :  { %s40_s0 = inlined_call_operand.vmem [shape: f32[2,256], index: 0, kind: input, shape index: {}]   ;;  %s41_s1 = inlined_call_operand.vmem [shape: f32[2,256], index: 1, kind: output, shape index: {}]  }
   0x1   :  { %v2_v0 = vld [vmem:[%s40_s0] sm:$0x3]  ;;  %v16_v1 = vld [vmem:[%s40_s0 + $0x2] sm:$0x3] }
   0x2   :  { %v5_v2 = vxor.u32 2147483648, %v2_v0  ;;  %v12_v3 = vxor.u32 2147483648, %v16_v1 }
   0x4   :  { %7 = vst [vmem:[%s41_s1] sm:$0x3] %v5_v2 }
   0x5   :  { %17 = vst [vmem:[%s41_s1 + $0x2] sm:$0x3] %v12_v3 }

// kernel: lovasz_hinge_loss.1
= control target key start
LH: loop header
LB: loop body
LE: loop exit
PB: predicated region body
PF: predicated region fallthrough
CT: control target
= control target key end

     0   :  { %vm363_vm10 = vcmask 7168   ;;  %s789_s0 = inlined_call_operand.vmem [shape: bf16[256,256], index: 0, kind: input, shape index: {}]   ;;  %s790_s3 = inlined_call_operand.vmem [shape: f32[8,3], index: 3, kind: input, shape index: {}]   ;;  %s791_s2 = inlined_call_operand.vmem [shape: bf16[8,256], index: 2, kind: input, shape index: {}]   ;;  %s792_s1 = inlined_call_operand.vmem [shape: f32[8,256], index: 1, kind: input, shape index: {}]   ;;  %s793_s4 = inlined_call_operand.vmem [shape: f32[8,1], index: 4, kind: output, shape index: {}]  }
   0x1   :  { %v427_v0 = vld [vmem:[%s789_s0 + $0x70] sm:$0xf]  ;;  %v514_v1 = vld [vmem:[%s789_s0 + $0x74] sm:$0xf0]  ;;  %v513_v5 = vld [vmem:[%s789_s0 + $0x74] sm:$0xf] }
   0x2   :  { %v491_v2 = vld [vmem:[%s789_s0 + $0xf0] sm:$0xf]  ;;  %v428_v3 = vor.u32 %v514_v1, %v427_v0  ;;  %v530_v4 = vld [vmem:[%s789_s0 + $0xf4] sm:$0xf0]  ;;  %v429_v6 = vld [vmem:[%s789_s0 + $0x78] sm:$0xf0] }
   0x3   :  { %v492_v7 = vor.u32 %v530_v4, %v491_v2  ;;  %v432_v8 = vor.u32 %v513_v5, %v429_v6  ;;  %v529_v9 = vld [vmem:[%s789_s0 + $0xf4] sm:$0xf]  ;;  %v493_v10 = vld [vmem:[%s789_s0 + $0xf8] sm:$0xf0]  ;;  %v419_v11 = vld [vmem:[%s789_s0 + $0x60] sm:$0xf] }
   0x4   :  { %225 = vmatpush.bf16.msra.mxu0 %v428_v3  ;;  %v496_v12 = vor.u32 %v529_v9, %v493_v10  ;;  %v512_v13 = vld [vmem:[%s789_s0 + $0x64] sm:$0xf0]  ;;  %v483_v14 = vld [vmem:[%s789_s0 + $0xe0] sm:$0xf]  ;;  %v511_v18 = vld [vmem:[%s789_s0 + $0x64] sm:$0xf] }
   0x5   :  { %v528_v15 = vld [vmem:[%s789_s0 + $0xe4] sm:$0xf0]  ;;  %238 = vmatpush.bf16.msra.mxu1 %v492_v7  ;;  %251 = vmatpush.bf16.msra.mxu2 %v432_v8  ;;  %v420_v16 = vor.u32 %v512_v13, %v419_v11  ;;  %v421_v19 = vld [vmem:[%s789_s0 + $0x68] sm:$0xf0]  ;;  %v527_v20 = vld [vmem:[%s789_s0 + $0xe4] sm:$0xf] }
   0x6   :  { %v484_v17 = vor.u32 %v528_v15, %v483_v14  ;;  %264 = vmatpush.bf16.msra.mxu3 %v496_v12  ;;  %v424_v21 = vor.u32 %v511_v18, %v421_v19  ;;  %v485_v22 = vld [vmem:[%s789_s0 + $0xe8] sm:$0xf0]  ;;  %v411_v23 = vld [vmem:[%s789_s0 + $0x50] sm:$0xf]  ;;  %v510_v24 = vld [vmem:[%s789_s0 + $0x54] sm:$0xf0] }
   0x7   :  { %v488_v25 = vor.u32 %v527_v20, %v485_v22  ;;  %v475_v26 = vld [vmem:[%s789_s0 + $0xd0] sm:$0xf]  ;;  %v526_v27 = vld [vmem:[%s789_s0 + $0xd4] sm:$0xf0]  ;;  %v509_v28 = vld [vmem:[%s789_s0 + $0x54] sm:$0xf]  ;;  %v412_v29 = vor.u32 %v510_v24, %v411_v23 }
   0x8   :  { %226 = vmatpush.bf16.msra.mxu0 %v420_v16  ;;  %v413_v30 = vld [vmem:[%s789_s0 + $0x58] sm:$0xf0]  ;;  %v525_v31 = vld [vmem:[%s789_s0 + $0xd4] sm:$0xf]  ;;  %v476_v33 = vor.u32 %v526_v27, %v475_v26  ;;  %v403_v35 = vld [vmem:[%s789_s0 + $0x40] sm:$0xf] }
   0x9   :  { %v477_v32 = vld [vmem:[%s789_s0 + $0xd8] sm:$0xf0]  ;;  %239 = vmatpush.bf16.msra.mxu1 %v484_v17  ;;  %252 = vmatpush.bf16.msra.mxu2 %v424_v21  ;;  %v416_v34 = vor.u32 %v509_v28, %v413_v30  ;;  %v508_v36 = vld [vmem:[%s789_s0 + $0x44] sm:$0xf0]  ;;  %v467_v37 = vld [vmem:[%s789_s0 + $0xc0] sm:$0xf] }
   0xa   :  { %265 = vmatpush.bf16.msra.mxu3 %v488_v25  ;;  %v480_v38 = vor.u32 %v525_v31, %v477_v32  ;;  %v524_v39 = vld [vmem:[%s789_s0 + $0xc4] sm:$0xf0]  ;;  %v507_v40 = vld [vmem:[%s789_s0 + $0x44] sm:$0xf]  ;;  %v405_v41 = vld [vmem:[%s789_s0 + $0x48] sm:$0xf0]  ;;  %v404_v44 = vor.u32 %v508_v36, %v403_v35 }
   0xb   :  { %v523_v42 = vld [vmem:[%s789_s0 + $0xc4] sm:$0xf]  ;;  %v469_v43 = vld [vmem:[%s789_s0 + $0xc8] sm:$0xf0]  ;;  %v468_v45 = vor.u32 %v524_v39, %v467_v37  ;;  %v408_v46 = vor.u32 %v507_v40, %v405_v41  ;;  %v395_v47 = vld [vmem:[%s789_s0 + $0x30] sm:$0xf]  ;;  %v277_v41 = vlaneseq }
   0xc   :  { %227 = vmatpush.bf16.msra.mxu0 %v412_v29  ;;  %v506_v48 = vld [vmem:[%s789_s0 + $0x34] sm:$0xf0]  ;;  %v459_v49 = vld [vmem:[%s789_s0 + $0xb0] sm:$0xf]  ;;  %v472_v50 = vor.u32 %v523_v42, %v469_v43  ;;  %v505_v52 = vld [vmem:[%s789_s0 + $0x34] sm:$0xf] }
   0xd   :  { %240 = vmatpush.bf16.msra.mxu1 %v476_v33  ;;  %253 = vmatpush.bf16.msra.mxu2 %v416_v34  ;;  %v522_v51 = vld [vmem:[%s789_s0 + $0xb4] sm:$0xf0]  ;;  %v397_v53 = vld [vmem:[%s789_s0 + $0x38] sm:$0xf0]  ;;  %v521_v54 = vld [vmem:[%s789_s0 + $0xb4] sm:$0xf]  ;;  %v396_v56 = vor.u32 %v506_v48, %v395_v47 }
   0xe   :  { %266 = vmatpush.bf16.msra.mxu3 %v480_v38  ;;  %v461_v55 = vld [vmem:[%s789_s0 + $0xb8] sm:$0xf0]  ;;  %v460_v57 = vor.u32 %v522_v51, %v459_v49  ;;  %v400_v58 = vor.u32 %v505_v52, %v397_v53  ;;  %v387_v59 = vld [vmem:[%s789_s0 + $0x20] sm:$0xf]  ;;  %v504_v60 = vld [vmem:[%s789_s0 + $0x24] sm:$0xf0] }
   0xf   :  { %v451_v61 = vld [vmem:[%s789_s0 + $0xa0] sm:$0xf]  ;;  %v464_v62 = vor.u32 %v521_v54, %v461_v55  ;;  %v520_v63 = vld [vmem:[%s789_s0 + $0xa4] sm:$0xf0]  ;;  %v503_v0 = vld [vmem:[%s789_s0 + $0x24] sm:$0xf]  ;;  %v388_v4 = vor.u32 %v504_v60, %v387_v59 }
  0x10   :  { %228 = vmatpush.bf16.msra.mxu0 %v404_v44  ;;  %v389_v1 = vld [vmem:[%s789_s0 + $0x28] sm:$0xf0]  ;;  %v519_v2 = vld [vmem:[%s789_s0 + $0xa4] sm:$0xf]  ;;  %v379_v5 = vld [vmem:[%s789_s0 + $0x10] sm:$0xf]  ;;  %v452_v6 = vor.u32 %v520_v63, %v451_v61 }
  0x11   :  { %241 = vmatpush.bf16.msra.mxu1 %v468_v45  ;;  %254 = vmatpush.bf16.msra.mxu2 %v408_v46  ;;  %v453_v3 = vld [vmem:[%s789_s0 + $0xa8] sm:$0xf0]  ;;  %v392_v7 = vor.u32 %v503_v0, %v389_v1  ;;  %v502_v8 = vld [vmem:[%s789_s0 + $0x14] sm:$0xf0]  ;;  %v443_v9 = vld [vmem:[%s789_s0 + $0x90] sm:$0xf] }
  0x12   :  { %267 = vmatpush.bf16.msra.mxu3 %v472_v50  ;;  %v518_v10 = vld [vmem:[%s789_s0 + $0x94] sm:$0xf0]  ;;  %v456_v11 = vor.u32 %v519_v2, %v453_v3  ;;  %v501_v12 = vld [vmem:[%s789_s0 + $0x14] sm:$0xf]  ;;  %v381_v13 = vld [vmem:[%s789_s0 + $0x18] sm:$0xf0]  ;;  %v380_v18 = vor.u32 %v502_v8, %v379_v5 }
  0x13   :  { %v20_v14 = vld [vmem:[%s790_s3] sm:$0xff]  ;;  %v517_v15 = vld [vmem:[%s789_s0 + $0x94] sm:$0xf]  ;;  %v445_v16 = vld [vmem:[%s789_s0 + $0x98] sm:$0xf0]  ;;  %v542_v17 = vmov 2   ;;  %v444_v20 = vor.u32 %v518_v10, %v443_v9  ;;  %v384_v21 = vor.u32 %v501_v12, %v381_v13 }
  0x14   :  { %229 = vmatpush.bf16.msra.mxu0 %v396_v56  ;;  %534 = vset.pattern.permute.xlu0 %v542_v17  ;;  %v744_v19 = vld [vmem:[%s791_s2] sm:$0xff]  ;;  %v500_v23 = vld [vmem:[%s789_s0 + $0x4] sm:$0xf0]  ;;  %v448_v25 = vor.u32 %v517_v15, %v445_v16  ;;  %v373_v28 = vld [vmem:[%s789_s0 + $0x8] sm:$0xf0]  ;;  %v543_v29 = vmov 0  }
  0x15   :  { %242 = vmatpush.bf16.msra.mxu1 %v460_v57  ;;  %255 = vmatpush.bf16.msra.mxu2 %v400_v58  ;;  %v371_v22 = vld [vmem:[%s789_s0] sm:$0xf]  ;;  %v516_v26 = vld [vmem:[%s789_s0 + $0x84] sm:$0xf0]  ;;  %v499_v27 = vld [vmem:[%s789_s0 + $0x4] sm:$0xf]  ;;  %v59_v32 = vunpack.c.l.b16 %v744_v19  ;;  %v60_v34 = vunpack.c.h.b16 %v744_v19  ;;  %v300_v55 = vunpack.c.l.bf16 %v744_v19  ;;  %v301_v3 = vunpack.c.h.bf16 %v744_v19 }
  0x16   :  { %268 = vmatpush.bf16.msra.mxu3 %v464_v62  ;;  %283 = vperm.xlu0 %534, %v20_v14   ;;  %v435_v24 = vld [vmem:[%s789_s0 + $0x80] sm:$0xf]  ;;  %v515_v30 = vld [vmem:[%s789_s0 + $0x84] sm:$0xf]  ;;  %v437_v31 = vld [vmem:[%s789_s0 + $0x88] sm:$0xf0]  ;;  %v372_v33 = vor.u32 %v500_v23, %v371_v22  ;;  %v376_v36 = vor.u32 %v499_v27, %v373_v28 }
  0x17   :  { %536 = vset.pattern.permute.xlu1 %v543_v29  ;;  %v436_v35 = vor.u32 %v516_v26, %v435_v24  ;;  %v440_v37 = vor.u32 %v515_v30, %v437_v31  ;;  %v61_v38 = vpack.c.b16 %v59_v32, %v59_v32  ;;  %v62_v39 = vpack.c.b16 %v60_v34, %v60_v34 }
  0x18   :  { %230 = vmatpush.bf16.msra.mxu0 %v388_v4  ;;  %291 = vperm.xlu1 %536, %v20_v14   ;;  %v544_v40 = vmov 1   ;;  %v278_v42 = vand.u32 127, %v277_v41 }
  0x19   :  { %243 = vmatpush.bf16.msra.mxu1 %v452_v6  ;;  %256 = vmatpush.bf16.msra.mxu2 %v392_v7 }
  0x1a   :  { %269 = vmatpush.bf16.msra.mxu3 %v456_v11  ;;  %v280_v43 = vcvt.s32.f32 %v278_v42  ;;  %v279_v46 = vadd.s32 128, %v278_v42 }
  0x1c   :  { %231 = vmatpush.bf16.msra.mxu0 %v380_v18  ;;  %v281_v48 = vcvt.s32.f32 %v279_v46 }
  0x1d   :  { %244 = vmatpush.bf16.msra.mxu1 %v444_v20  ;;  %257 = vmatpush.bf16.msra.mxu2 %v384_v21 }
  0x1e   :  { %270 = vmatpush.bf16.msra.mxu3 %v448_v25  ;;  %535 = vset.pattern.permute.xlu0 %v544_v40 }
  0x1f   :  { %55 = vperm.xlu0 %535, %v20_v14  }
  0x20   :  { %232 = vmatpush.bf16.msra.mxu0 %v372_v33 }
  0x21   :  { %245 = vmatpush.bf16.msra.mxu1 %v436_v35  ;;  %258 = vmatpush.bf16.msra.mxu2 %v376_v36 }
  0x22   :  { %271 = vmatpush.bf16.msra.mxu3 %v440_v37 }
  0x23   :  { %233 = vmatmul.bf16.vlgmr.msra.gmra.mxu0 %v61_v38 }
  0x24   :  { %246 = vmatmul.bf16.vlgmr.msra.gmra.mxu1 %v62_v39  ;;  %259 = vmatmul.bf16.vlgmr.msra.gmra.mxu2 %v61_v38 }
  0x25   :  { %272 = vmatmul.bf16.vlgmr.msra.gmra.mxu3 %v62_v39 }
  0x27   :  { %537 = vset.pattern.permute.xlu0 %v543_v29 }
  0x88   :  { %v284_v44 = vpop.permute.xlu0 %283 }
  0x89   :  { %v286_v45 = vadd.f32 %v284_v44, %v280_v43  ;;  %v287_v51 = vadd.f32 %v284_v44, %v281_v48  ;;  %v18_v43 = vld [vmem:[%s792_s1] sm:$0xff]  ;;  %v19_v44 = vld [vmem:[%s792_s1 + $0x8] sm:$0xff] }
  0x8a   :  { %v292_v56 = vpop.permute.xlu1 %291 }
  0x8b   :  { %v288_v47 = vadd.f32 1.0, %v286_v45  ;;  %v289_v59 = vadd.f32 1.0, %v287_v51  ;;  %v356_v51 = vmax.f32 %v18_v43, 0.0 }
  0x8d   :  { %v497_v50 = vadd.f32 -1.0, %v288_v47  ;;  %v296_v61 = vadd.f32 %v292_v56, %v288_v47  ;;  %v498_v0 = vadd.f32 -1.0, %v289_v59  ;;  %v297_v12 = vadd.f32 %v292_v56, %v289_v59 }
  0x8e   :  { %vm312_vm0 = vcmp.eq.f32.partialorder %v288_v47, 1.0  ;;  %vm313_vm2 = vcmp.eq.f32.partialorder %v289_v59, 1.0 }
  0x8f   :  { %v306_v58 = vadd.f32 %v497_v50, %v292_v56  ;;  %v307_v11 = vadd.f32 %v498_v0, %v292_v56 }
  0x91   :  { %v56_v49 = vpop.permute.xlu0 %55 }
  0xa0   :  { %v234_v52 = vpop.f32.mrf.mxu0 }
  0xa1   :  { %v235_v53 = vadd.f32 %v234_v52, %v56_v49  ;;  %v247_v54 = vpop.f32.mrf.mxu1  ;;  %v357_v52 = vmax.f32 %v19_v44, 0.0 }
  0xa3   :  { %v248_v57 = vadd.f32 %v247_v54, %v235_v53 }
  0xa5   :  { %v302_v60 = vsub.f32 %v248_v57, %v300_v55  ;;  %v298_v6 = vsub.f32 %v296_v61, %v248_v57  ;;  %v294_v24 = vsub.f32 %v292_v56, %v248_v57 }
  0xa7   :  { %v260_v62 = vpop.f32.mrf.mxu2  ;;  %v308_v63 = vsub.f32 %v306_v58, %v302_v60  ;;  %v314_v19 = vsub.f32 %v292_v56, %v302_v60 }
  0xa8   :  { %v261_v1 = vadd.f32 %v260_v62, %v56_v49  ;;  %v273_v2 = vpop.f32.mrf.mxu3  ;;  %v236_v4 = vpop.f32.mrf.mxu0 }
  0xa9   :  { %v249_v5 = vpop.f32.mrf.mxu1  ;;  %v310_v7 = vmax.f32 %v308_v63, 1.0 }
  0xaa   :  { %v274_v8 = vadd.f32 %v273_v2, %v261_v1 }
  0xab   :  { %v324_v9 = vmul.f32 %v310_v7, %v298_v6  ;;  %v316_v25 = vsel %vm312_vm0, %v310_v7, %v314_v19  ;;  %v320_v36 = vmul.f32 %v310_v7, %v294_v24 }
  0xac   :  { %v303_v10 = vsub.f32 %v274_v8, %v301_v3  ;;  %v299_v15 = vsub.f32 %v297_v12, %v274_v8  ;;  %v295_v32 = vsub.f32 %v292_v56, %v274_v8  ;;  %v318_v35 = vmul.f32 %v316_v25, %v298_v6 }
  0xad   :  { %538 = vrcp.f32 %v324_v9  ;;  %v335_v29 = vand.u32 2147483647, %v324_v9  ;;  %v337_v30 = vand.u32 2147483648, %v324_v9  ;;  %vm331_vm3 = vweird.f32 %v324_v9 }
  0xae   :  { %v309_v13 = vsub.f32 %v307_v11, %v303_v10  ;;  %v315_v27 = vsub.f32 %v292_v56, %v303_v10  ;;  %v322_v48 = vsub.f32 %v318_v35, %v320_v36 }
  0xaf   :  { %v262_v14 = vpop.f32.mrf.mxu2  ;;  %vm336_vm5 = vcmp.eq.f32.partialorder %v335_v29, 8.507059e+37  ;;  %v338_v40 = vor.u32 1.1754944e-38, %v337_v30 }
  0xb0   :  { %v311_v16 = vmax.f32 %v309_v13, 1.0  ;;  %v275_v17 = vpop.f32.mrf.mxu3 }
  0xb2   :  { %v325_v18 = vmul.f32 %v311_v16, %v299_v15  ;;  %v317_v33 = vsel %vm313_vm2, %v311_v16, %v315_v27  ;;  %v321_v39 = vmul.f32 %v311_v16, %v295_v32 }
  0xb3   :  { %v539_v20 = vpop.eup %538  ;;  %v319_v42 = vmul.f32 %v317_v33, %v299_v15 }
  0xb4   :  { %540 = vrcp.f32 %v325_v18  ;;  %v327_v21 = vmul.f32 %v539_v20, %v324_v9  ;;  %vm332_vm1 = vweird.f32 %v539_v20  ;;  %v351_v41 = vand.u32 2147483648, %v325_v18 }
  0xb5   :  { %vm774_vm4 = vmor %vm331_vm3, %vm332_vm1  ;;  %v349_v46 = vand.u32 2147483647, %v325_v18  ;;  %vm345_vm7 = vweird.f32 %v325_v18  ;;  %v323_v53 = vsub.f32 %v319_v42, %v321_v39 }
  0xb6   :  { %v328_v22 = vsub.f32 1.0, %v327_v21  ;;  %v352_v50 = vor.u32 1.1754944e-38, %v351_v41 }
  0xb7   :  { %vm350_vm9 = vcmp.eq.f32.partialorder %v349_v46, 8.507059e+37 }
  0xb8   :  { %v329_v23 = vmul.f32 %v539_v20, %v328_v22 }
  0xba   :  { %v541_v26 = vpop.eup %540  ;;  %v330_v28 = vadd.f32 %v539_v20, %v329_v23 }
  0xbb   :  { %v341_v31 = vmul.f32 %v541_v26, %v325_v18  ;;  %vm346_vm6 = vweird.f32 %v541_v26 }
  0xbc   :  { %v334_v37 = vsel %vm774_vm4, %v539_v20, %v330_v28  ;;  %vm347_vm8 = vmor %vm345_vm7, %vm346_vm6 }
  0xbd   :  { %v342_v38 = vsub.f32 1.0, %v341_v31  ;;  %v339_v47 = vsel %vm336_vm5, %v338_v40, %v334_v37 }
  0xbe   :  { %v354_v55 = vmul.f32 %v339_v47, %v322_v48 }
  0xbf   :  { %v343_v45 = vmul.f32 %v541_v26, %v342_v38 }
  0xc0   :  { %v358_v58 = vmul.f32 %v356_v51, %v354_v55 }
  0xc1   :  { %v344_v49 = vadd.f32 %v541_v26, %v343_v45 }
  0xc3   :  { %v348_v54 = vsel %vm347_vm8, %v541_v26, %v344_v49 }
  0xc4   :  { %v353_v56 = vsel %vm350_vm9, %v352_v50, %v348_v54 }
  0xc5   :  { %v355_v57 = vmul.f32 %v353_v56, %v323_v53 }
  0xc7   :  { %v359_v59 = vmul.f32 %v357_v52, %v355_v57 }
  0xc9   :  { %v360_v60 = vadd.f32 %v359_v59, %v358_v58 }
  0xcb   :  { %361 = vadd.xlane.f32.xlu1 %v360_v60 }
 0x13e   :  { %v362_v61 = vpop.xlane.xlu1 %361 }
 0x13f   :  { %364 = vst.msk [vmem:[%s793_s4] sm:$0xff] %vm363_vm10, %v362_v61 }

</bundles_post_ra>
